<compile_context>
chip_gen: v7x
topology: tpu7x:2x2x1
jax: 0.10.0
libtpu: 0.0.40
codegen_flags: <defaults>
</compile_context>

<pallas_src>
import jax
import jax.numpy as jnp
from jax import lax
from jax.experimental import pallas as pl
from jax.experimental.pallas import tpu as pltpu


def _round_up(x: int, m: int) -> int:
    return (x + m - 1) // m * m


def make_char_cnn_kernel(window_size: int, l_out_pad: int, vocab_pad: int, filter_pad: int):
    def kernel(idx_ref, w_ref, b_ref, o_ref):
        # idx_ref: (TM*l_out_pad, K) int32  im2col char ids (one row per word x output position)
        # w_ref:   (K*Vp, Fp)        bf16   folded (embedding @ conv-tap) weights, tap-major, resident
        # b_ref:   (1, Fp)           f32    conv bias (zero-padded to Fp), resident
        # o_ref:   (TM, Fp)          f32    per-word max-pooled conv output (lane-dense, Fp=128k)
        tm = o_ref.shape[0]
        idx = idx_ref[...]                                            # (rows, K) int32
        lane = lax.broadcasted_iota(jnp.int32, (1, vocab_pad), 1)     # (1, Vp)

        # One-hot per tap (int32 compare -> bf16 cast), concatenated along lanes.  Each block is
        # exactly Vp=128 lanes, so the concat is layout-free and the K taps collapse into a
        # single MXU matmul with contraction depth K*Vp (internal MXU accumulation; no f32
        # vector adds, one result drain instead of K).
        oh = jnp.concatenate(
            [(idx[:, k:k + 1] == lane).astype(jnp.bfloat16) for k in range(window_size)],
            axis=1)                                                   # (rows, K*Vp) bf16
        conv = jnp.dot(oh, w_ref[...],
                       preferred_element_type=jnp.float32)            # (rows, Fp) f32

        # l_out_pad % 8 == 0 -> clean sublane split (no relayout); padded output positions carry
        # ~-1e30 via the sentinel vocab row so the max ignores them.
        conv = conv.reshape(tm, l_out_pad, filter_pad)
        mx = jnp.max(conv, axis=1)                                    # max over time (tm, Fp)
        o_ref[...] = (mx + b_ref[...]).astype(o_ref.dtype)            # bias AFTER max (equivalent)

    return kernel


def char_cnn_embedding(indices, emb_table, conv_w, conv_b,
                       window_size: int, padding: int, tm: int = 256):
    """indices: (N, S, W) int. Returns (N, S, filter_num) float32."""
    N, S, W = indices.shape
    vocab_size, e_char = emb_table.shape
    filter_num = conv_w.shape[0]
    K = window_size

    l_out = W + 2 * padding - K + 1
    assert l_out >= 1
    l_out_p = _round_up(l_out, 8)            # pad output positions to a sublane multiple
    f_pad = _round_up(filter_num, 128)       # lane-dense output stores / full MXU N-dim
    pad_id = vocab_size                      # extra zero-embedding row -> conv zero padding
    neg_id = vocab_size + 1                  # sentinel row (-1e30) -> masks padded out positions
    v_pad = _round_up(vocab_size + 2, 128)

    NS = N * S
    ns8 = _round_up(max(NS, 1), 8)
    # Word tile: big enough to amortize the ~0.35us per-grid-step overhead, but capped at half
    # of the (padded) word count so the grid always has >= 2 steps and ("parallel",) can shard
    # across both v7x TensorCores.  tm=256 keeps the fused (rows, K*Vp) bf16 LHS + f32 conv
    # intermediates comfortably inside the 32 MiB VMEM limit.
    tm = min(tm, _round_up(pl.cdiv(ns8, 2), 8))
    tm = max(8, (tm // 8) * 8)
    ns_p = _round_up(NS, tm)                 # pad word count; extra rows are sliced off below

    # TODO(synk): dropout is identity in eval mode; training-mode masking (pltpu.prng_*) not implemented.

    # ---- fold the (bf16) embedding table into each conv tap, tap-major:
    #      w_cat[k*Vp + v, f] = emb_ext[v] . conv_w[f, :, k]  ----
    emb_q = emb_table.astype(jnp.bfloat16).astype(jnp.float32)
    w_q = conv_w.astype(jnp.bfloat16).astype(jnp.float32)
    emb_ext = jnp.zeros((v_pad, e_char), jnp.float32).at[:vocab_size].set(emb_q)
    w_fold = jnp.einsum('vc,fck->kvf', emb_ext, w_q)                    # (K, Vp, F)
    w_fold = jnp.pad(w_fold, ((0, 0), (0, 0), (0, f_pad - filter_num)))  # pad filters to 128
    w_fold = w_fold.at[:, neg_id, :].set(-1e30)                         # sentinel masking rows
    w_cat = w_fold.reshape(K * v_pad, f_pad).astype(jnp.bfloat16)       # (K*Vp, Fp) resident ~160 KB
    bias = jnp.zeros((1, f_pad), jnp.float32).at[0, :filter_num].set(
        conv_b.astype(jnp.float32))

    # ---- int32 im2col indices: stream 4 B/char/tap instead of 4*e_char B of f32 embeddings ----
    idx = indices.reshape(NS, W).astype(jnp.int32)
    idx = jnp.pad(idx, ((0, ns_p - NS), (0, 0)), constant_values=pad_id)
    t_len = l_out_p + K - 1
    idx_t = jnp.pad(idx, ((0, 0), (padding, t_len - W - padding)),
                    constant_values=pad_id)                             # (ns_p, t_len)
    cols = jnp.stack([idx_t[:, k:k + l_out_p] for k in range(K)], axis=2)  # (ns_p, l_out_p, K)
    if l_out_p > l_out:
        # padded output positions: tap-0 id -> sentinel row => conv value ~-1e30 (ignored by max)
        cols = cols.at[:, l_out:, 0].set(neg_id)
    cols = cols.reshape(ns_p * l_out_p, K)

    n_steps = ns_p // tm
    kernel = make_char_cnn_kernel(K, l_out_p, v_pad, f_pad)
    flops = 2 * ns_p * l_out_p * (K * v_pad) * f_pad
    bytes_accessed = cols.size * 4 + w_cat.size * 2 + bias.size * 4 + ns_p * f_pad * 4

    out = pl.pallas_call(
        kernel,
        out_shape=jax.ShapeDtypeStruct((ns_p, f_pad), jnp.float32),
        grid_spec=pltpu.PrefetchScalarGridSpec(
            num_scalar_prefetch=0,
            grid=(n_steps,),
            in_specs=[
                pl.BlockSpec((tm * l_out_p, K), lambda i: (i, 0)),       # streamed im2col indices
                pl.BlockSpec((K * v_pad, f_pad), lambda i: (0, 0)),      # resident folded weights
                pl.BlockSpec((1, f_pad), lambda i: (0, 0)),              # resident bias
            ],
            out_specs=pl.BlockSpec((tm, f_pad), lambda i: (i, 0)),       # lane-dense (Fp=128) store
        ),
        compiler_params=pltpu.CompilerParams(
            dimension_semantics=("parallel",),
            vmem_limit_bytes=32 * 1024 * 1024,   # ample headroom; leaves > half of v7x's 64 MiB
        ),
        cost_estimate=pl.CostEstimate(
            flops=flops, transcendentals=0, bytes_accessed=bytes_accessed),
    )(cols, w_cat, bias)

    return out[:NS, :filter_num].reshape(N, S, filter_num)


def reference(indices, emb_table, conv_w, conv_b, window_size, padding):
    """Plain-JAX reference mirroring the PyTorch semantics."""
    N, S, W = indices.shape
    F = conv_w.shape[0]
    x = jnp.take(emb_table, indices, axis=0).reshape(N * S, W, -1)
    xp = jnp.pad(x, ((0, 0), (padding, padding), (0, 0)))
    l_out = xp.shape[1] - window_size + 1
    acc = jnp.zeros((N * S, l_out, F), jnp.float32)
    for k in range(window_size):
        acc = acc + jnp.einsum('nlc,fc->nlf', xp[:, k:k + l_out, :], conv_w[:, :, k])
    acc = acc + conv_b[None, None, :]
    return jnp.max(acc, axis=1).reshape(N, S, F)


if __name__ == "__main__":
    # small shapes consistent with the module
    N, S, W = 2, 8, 16          # batch, max_sentence_len, max_word_len
    e_char = 32
    filter_num = 64
    window_size = 5
    padding = 1
    vocab_size = 96
    pad_index = 0

    key = jax.random.PRNGKey(0)
    k_emb, k_w, k_b, k_idx = jax.random.split(key, 4)

    emb_table = 0.1 * jax.random.normal(k_emb, (vocab_size, e_char), jnp.float32)
    emb_table = emb_table.at[pad_index].set(0.0)        # padding_idx row zeroed
    conv_w = 0.1 * jax.random.normal(k_w, (filter_num, e_char, window_size),
                                     jnp.float32)       # PyTorch Conv1d weight layout
    conv_b = 0.01 * jax.random.normal(k_b, (filter_num,), jnp.float32)

    indices = jax.random.randint(k_idx, (N, S, W), 0, vocab_size, jnp.int32)

    out = char_cnn_embedding(indices, emb_table, conv_w, conv_b,
                             window_size, padding)
    out = jax.block_until_ready(out)

    # reference built from the same bf16-rounded parameters the kernel uses
    emb_qr = emb_table.astype(jnp.bfloat16).astype(jnp.float32)
    w_qr = conv_w.astype(jnp.bfloat16).astype(jnp.float32)
    ref = reference(indices, emb_qr, w_qr, conv_b, window_size, padding)

    assert out.shape == (N, S, filter_num)
    assert jnp.allclose(out, ref, atol=1e-2, rtol=1e-2), "mismatch vs reference"

    print("KERNEL_OK")
</pallas_src>

<mosaic_0001>
module attributes {stable_mosaic.version = 11 : i64} {
  func.func @kernel(%arg0: i32, %arg1: memref<128x5xi32, #tpu.memory_space<vmem>>, %arg2: memref<640x128xbf16, #tpu.memory_space<vmem>>, %arg3: memref<1x128xf32, #tpu.memory_space<vmem>>, %arg4: memref<8x128xf32, #tpu.memory_space<vmem>>) attributes {dimension_semantics = [#tpu.dimension_semantics<parallel>], iteration_bounds = array<i64: 2>, scalar_prefetch = 0 : i64, scratch_operands = 0 : i64, tpu.core_type = #tpu.core_type<tc>, window_params = [{transform_indices = @transform_0, window_bounds = array<i64: 128, 5>}, {pipeline_mode = #tpu.pipeline_mode<synchronous>, transform_indices = @transform_1, window_bounds = array<i64: 640, 128>}, {pipeline_mode = #tpu.pipeline_mode<synchronous>, transform_indices = @transform_2, window_bounds = array<i64: 1, 128>}, {transform_indices = @transform_3, window_bounds = array<i64: 8, 128>}]} {
    %c0 = arith.constant 0 : index
    %c0_0 = arith.constant 0 : index
    %0 = vector.load %arg1[%c0, %c0_0] : memref<128x5xi32, #tpu.memory_space<vmem>>, vector<128x5xi32>
    %1 = tpu.iota {dimensions = array<i32: 1>} : vector<1x128xi32>
    %2 = vector.extract_strided_slice %0 {offsets = [0, 0], sizes = [128, 1], strides = [1, 1]} : vector<128x5xi32> to vector<128x1xi32>
    %3 = vector.broadcast %2 : vector<128x1xi32> to vector<128x128xi32>
    %4 = vector.broadcast %1 : vector<1x128xi32> to vector<128x128xi32>
    %5 = arith.cmpi eq, %3, %4 : vector<128x128xi32>
    %6 = arith.extui %5 : vector<128x128xi1> to vector<128x128xi32>
    %7 = arith.sitofp %6 : vector<128x128xi32> to vector<128x128xf32>
    %8 = arith.truncf %7 : vector<128x128xf32> to vector<128x128xbf16>
    %9 = vector.extract_strided_slice %0 {offsets = [0, 1], sizes = [128, 1], strides = [1, 1]} : vector<128x5xi32> to vector<128x1xi32>
    %10 = vector.broadcast %9 : vector<128x1xi32> to vector<128x128xi32>
    %11 = vector.broadcast %1 : vector<1x128xi32> to vector<128x128xi32>
    %12 = arith.cmpi eq, %10, %11 : vector<128x128xi32>
    %13 = arith.extui %12 : vector<128x128xi1> to vector<128x128xi32>
    %14 = arith.sitofp %13 : vector<128x128xi32> to vector<128x128xf32>
    %15 = arith.truncf %14 : vector<128x128xf32> to vector<128x128xbf16>
    %16 = vector.extract_strided_slice %0 {offsets = [0, 2], sizes = [128, 1], strides = [1, 1]} : vector<128x5xi32> to vector<128x1xi32>
    %17 = vector.broadcast %16 : vector<128x1xi32> to vector<128x128xi32>
    %18 = vector.broadcast %1 : vector<1x128xi32> to vector<128x128xi32>
    %19 = arith.cmpi eq, %17, %18 : vector<128x128xi32>
    %20 = arith.extui %19 : vector<128x128xi1> to vector<128x128xi32>
    %21 = arith.sitofp %20 : vector<128x128xi32> to vector<128x128xf32>
    %22 = arith.truncf %21 : vector<128x128xf32> to vector<128x128xbf16>
    %23 = vector.extract_strided_slice %0 {offsets = [0, 3], sizes = [128, 1], strides = [1, 1]} : vector<128x5xi32> to vector<128x1xi32>
    %24 = vector.broadcast %23 : vector<128x1xi32> to vector<128x128xi32>
    %25 = vector.broadcast %1 : vector<1x128xi32> to vector<128x128xi32>
    %26 = arith.cmpi eq, %24, %25 : vector<128x128xi32>
    %27 = arith.extui %26 : vector<128x128xi1> to vector<128x128xi32>
    %28 = arith.sitofp %27 : vector<128x128xi32> to vector<128x128xf32>
    %29 = arith.truncf %28 : vector<128x128xf32> to vector<128x128xbf16>
    %30 = vector.extract_strided_slice %0 {offsets = [0, 4], sizes = [128, 1], strides = [1, 1]} : vector<128x5xi32> to vector<128x1xi32>
    %31 = vector.broadcast %30 : vector<128x1xi32> to vector<128x128xi32>
    %32 = vector.broadcast %1 : vector<1x128xi32> to vector<128x128xi32>
    %33 = arith.cmpi eq, %31, %32 : vector<128x128xi32>
    %34 = arith.extui %33 : vector<128x128xi1> to vector<128x128xi32>
    %35 = arith.sitofp %34 : vector<128x128xi32> to vector<128x128xf32>
    %36 = arith.truncf %35 : vector<128x128xf32> to vector<128x128xbf16>
    %37 = tpu.concatenate %8, %15, %22, %29, %36 in 1 : vector<128x128xbf16>, vector<128x128xbf16>, vector<128x128xbf16>, vector<128x128xbf16>, vector<128x128xbf16> -> vector<128x640xbf16>
    %c0_1 = arith.constant 0 : index
    %c0_2 = arith.constant 0 : index
    %38 = vector.load %arg2[%c0_1, %c0_2] : memref<640x128xbf16, #tpu.memory_space<vmem>>, vector<640x128xbf16>
    %cst = arith.constant dense<0.000000e+00> : vector<128x128xf32>
    %39 = tpu.matmul %37, %38, %cst {dimension_numbers = #tpu.dot_dimension_numbers<[1], [0], [0], [1], [0, 0, 1, 1], [], []>} : vector<128x640xbf16>, vector<640x128xbf16>, vector<128x128xf32> -> vector<128x128xf32>
    %40 = vector.shape_cast %39 : vector<128x128xf32> to vector<8x16x128xf32>
    %cst_3 = arith.constant dense<0xFF800000> : vector<8x128xf32>
    %41 = vector.multi_reduction <maximumf>, %40, %cst_3 [1] : vector<8x16x128xf32> to vector<8x128xf32>
    %c0_4 = arith.constant 0 : index
    %c0_5 = arith.constant 0 : index
    %42 = vector.load %arg3[%c0_4, %c0_5] : memref<1x128xf32, #tpu.memory_space<vmem>>, vector<1x128xf32>
    %43 = vector.broadcast %42 : vector<1x128xf32> to vector<8x128xf32>
    %44 = arith.addf %41, %43 : vector<8x128xf32>
    %c0_6 = arith.constant 0 : index
    %c0_7 = arith.constant 0 : index
    %45 = vector.load %arg4[%c0_6, %c0_7] : memref<8x128xf32, #tpu.memory_space<vmem>>, vector<8x128xf32>
    tpu.vector_store %arg4[%c0_6, %c0_7], %44 {strides = array<i32>} : memref<8x128xf32, #tpu.memory_space<vmem>>, vector<8x128xf32>,
    return
  }
  func.func @transform_0(%arg0: i32) -> (i32, i32) {
    %c0_i32 = arith.constant 0 : i32
    %c0_i32_0 = arith.constant 0 : i32
    return %arg0, %c0_i32 : i32, i32
  }
  func.func @transform_1(%arg0: i32) -> (i32, i32) {
    %c0_i32 = arith.constant 0 : i32
    %c0_i32_0 = arith.constant 0 : i32
    %c0_i32_1 = arith.constant 0 : i32
    return %c0_i32, %c0_i32_0 : i32, i32
  }
  func.func @transform_2(%arg0: i32) -> (i32, i32) {
    %c0_i32 = arith.constant 0 : i32
    %c0_i32_0 = arith.constant 0 : i32
    %c0_i32_1 = arith.constant 0 : i32
    return %c0_i32, %c0_i32_0 : i32, i32
  }
  func.func @transform_3(%arg0: i32) -> (i32, i32) {
    %c0_i32 = arith.constant 0 : i32
    %c0_i32_0 = arith.constant 0 : i32
    return %arg0, %c0_i32 : i32, i32
  }
}

</mosaic_0001>

<bundles_post_ra>
// kernel: tpu_custom_call.1
= control target key start
LH: loop header
LB: loop body
LE: loop exit
PB: predicated region body
PF: predicated region fallthrough
CT: control target
= control target key end

     0   :  { %8 = vsyncpa [#allocation3], 0  ;;  %s2680_s0 = inlined_call_operand.vmem [shape: s32[256,5], index: 0, kind: input, shape index: {}]   ;;  %s2681_s1 = inlined_call_operand.hbm [shape: bf16[640,128], index: 1, kind: input, shape index: {}]   ;;  %s2682_s2 = inlined_call_operand.vmem [shape: f32[1,128], index: 2, kind: input, shape index: {}]   ;;  %s2683_s3 = inlined_call_operand.hbm [shape: f32[16,128], index: 3, kind: output, shape index: {}]  }
   0x1   :  { %9 = vsyncpa [#allocation4], 0 }
   0x2   :  { %11 = vsyncpa [#allocation4 + $0x1], 0  ;;  %s2191_s12 = smov 0   ;;  %s2193_s13 = smov 0  }
   0x3   :  { %s2195_s14 = smov 0   ;;  %s2197_s15 = smov 0  }
   0x4 LB: > { %s2212_s16 = sadd.s32 4294967295, %s2159_s15   ;;  %s1523_s17 = sadd.s32 4294967294, %s2159_s15   ;;  %s2159_s15 = sphi %s2197_s15, %s2699_s15   ;;  %s2155_s14 = sphi %s2195_s14, %s2698_s14   ;;  %s2151_s13 = sphi %s2193_s13, %s2697_s13   ;;  %s2147_s12 = sphi %s2191_s12, %s2696_s12  }
   0x5   : > { %s2216_s18 = sadd.s32 1, %s2159_s15   ;;  %s92_s19 = sadd.s32 1, %s2155_s14 }
   0x6   : > { %s89_s20 = ssub.s32 %s2159_s15, %s2216_s18  ;;  %p102_p0 = scmp.ne.s32.totalorder %s2155_s14, %s2151_s13 }
   0x7   : > { %p90_p1 = scmp.eq.s32.totalorder %s89_s20, 0  ;;  %p103_p2 = scmp.eq.s32.totalorder %s2212_s16, 1 }
   0x8   : > { %p108_p3 = scmp.ne.s32.totalorder %s2151_s13, %s2147_s12  ;;  %p109_p4 = scmp.eq.s32.totalorder %s1523_s17, 1 }
   0x9   : > { %s2227_s21 = scalar_select %p90_p1, %s2155_s14, %s92_s19  }
   0xa   : > { %p2229_p5 = por %p103_p2, %p102_p0  ;;  %p2233_p6 = por %p109_p4, %p108_p3 }
   0xb   : > { %p1524_p7 = scmp.ge.s32.totalorder %s2159_s15, 1  ;;  %p116_p8 = scmp.lt.s32.totalorder %s2159_s15, 3 }
   0xc   : > { %s2687_s22 = scalar_select %p2229_p5, 1, 0 }
   0xd   : > { %s2688_s23 = scalar_select %p2233_p6, 1, 0 }
   0xe   : > { %p2684_p9 = scmp.eq.s32.totalorder %s2212_s16, 0  ;;  %p2240_p10 = pnand %p1524_p7, %p116_p8 }
   0xf   : > { %s2161_s25 = smov [#allocation2]   ;;  %s2065_s30 = scalar_lea.hbm %s2681_s1, 5120 }
  0x10   : > { %s2689_s24 = scalar_select %p2240_p10, 1, 0 }
  0x11   : > { %s128_s26 = sshll.u32 %s2161_s25, 4  ;;  %p1935_p11 = pneg %p2240_p10  ;;  %s129_s26 = int_to_ptr.vmem [resolvable:$true] %s128_s26 }
  0x12   : > { %p2066_p13 = scmp.ne.s32.totalorder %s2681_s1, %s2065_s30  ;;  %p2072_p3 = scmp.lt.u32.totalorder %s2065_s30, %s2681_s1 }
  0x13   : > { %p2248_p12 = pnand %p2684_p9, %p1935_p11 }
  0x15   : > { %p2067_p0 = pneg %p2248_p12 }
  0x17   : > { %p2068_p1 = pnand %p2067_p0, %p2066_p13 }
  0x19   : > { %p2069_p2 = pneg %p2068_p1 }
  0x1b   : > { %p2074_p4 = pnand %p2072_p3, %p2069_p2 }
  0x1d   : > { %2077 = shalt.err (!%p2074_p4)
}
  0x1e   : > { %s2078_s8 = scalar_lea.vmem %s129_s26, 5120  ;;  %p2086_p9 = scmp.lt.s32.totalorder %s129_s26, %s129_s26 }
  0x1f   : > { %p2079_p7 = scmp.ne.s32.totalorder %s129_s26, %s2078_s8  ;;  %p2087_p6 = scmp.lt.s32.totalorder %s2078_s8, %s2078_s8 }
  0x21   : > { %p2081_p8 = pnand %p2079_p7, %p2067_p0  ;;  %p2088_p5 = por %p2087_p6, %p2086_p9 }
  0x23   : > { %p2082_p11 = pneg %p2081_p8 }
  0x25   : > { %p2089_p10 = pnand %p2088_p5, %p2082_p11 }
  0x27   : > { %2092 = shalt.err (!%p2089_p10)
}
  0x28   : > { %s2162_s9 = smov 64   ;;  %s2163_s10 = smov 4  }
  0x29   : > { %1938 = dma.hbm_to_vmem [thread:$0]  (!%p2248_p12), %s2681_s1, 5120, %s129_s26, [#allocation3], %s2162_s9, %s2162_s9, %s2163_s10  }
  0x2a   : > { %p2691_p13 = scmp.ne.s32.totalorder %s2689_s24, 0 }
  0x2b   : > { %p2692_p1 = scmp.eq.s32.totalorder (!%p2691_p13), %s2212_s16, 0 }
  0x2c   : > { %156 = sbr.rel (%p2691_p13) target bundleno = 667 (0x29b), region = 32 }
  0x33   : > { %2138 = dma.done.wait (%p2692_p1), [#allocation3], 5120   ;;  %p2693_p0 = pmov %p2692_p1 }
  0x34   : > { %s1530_s19 = sshll.u32 %s2212_s16, 4  ;;  %v2164_v0 = vmov 3   ;;  %v2165_v1 = vmov 0   ;;  %v2025_v6 = vld [vmem:[#allocation2 + $0x40] sm:$0xff]   ;;  %v2027_v8 = vld [vmem:[#allocation2 + $0x48] sm:$0xff]   ;;  %v2029_v10 = vld [vmem:[#allocation2 + $0x50] sm:$0xff]   ;;  %v203_v55 = vlaneseq }
  0x35   : > { %2140 = vsyncadd (%p2693_p0), [#allocation3], 4294962176  ;;  %1988 = vset.pattern.permute.xlu0 %v2164_v0  ;;  %1987 = vset.pattern.permute.xlu1 %v2165_v1  ;;  %p181_p5 = scmp.lt.s32.totalorder %s1530_s19, 31  ;;  %v2026_v7 = vld [vmem:[#allocation2] sm:$0xff]   ;;  %v2028_v9 = vld [vmem:[#allocation2 + $0x8] sm:$0xff]   ;;  %v2166_v12 = vmov 1  }
  0x36   : > { %1737 = vmatprep.subr.bf16.mxu0 %v2025_v6  ;;  %v2030_v11 = vld [vmem:[#allocation2 + $0x10] sm:$0xff]   ;;  %v2031_v13 = vld [vmem:[#allocation2 + $0x58] sm:$0xff]   ;;  %v2167_v14 = vmov 2   ;;  %v2036_v17 = vld [vmem:[#allocation2 + $0xc0] sm:$0xff]   ;;  %v2168_v52 = vmov 4   ;;  %v2395_v58 = vand.u32 127, %v203_v55 }
  0x37   : > { %s2701_s19 = smov (!%p181_p5, %s1530_s19), 31  ;;  %1738 = vmatpush3.bf16.msra.mxu0 %v2026_v7  ;;  %v2032_v16 = vld [vmem:[#allocation2 + $0x18] sm:$0xff]   ;;  %v2033_v19 = vld [vmem:[#allocation2 + $0x60] sm:$0xff]   ;;  %1801 = vmatprep.subr.bf16.mxu1 %v2036_v17  ;;  %v2040_v22 = vld [vmem:[#allocation2 + $0xc8] sm:$0xff]   ;;  %v2169_v61 = vmov 1.0|1.0  }
  0x38   : > { %s1531_s20 = sshll.u32 %s2701_s19, 3  ;;  %1739 = vmatprep.subr.bf16.mxu0 %v2027_v8  ;;  %v2034_v20 = vld [vmem:[#allocation2 + $0x20] sm:$0xff]   ;;  %v2035_v24 = vld [vmem:[#allocation2 + $0x68] sm:$0xff]   ;;  %v2044_v27 = vld [vmem:[#allocation2 + $0xd0] sm:$0xff]   ;;  %s177_s29 = sand.u32 1, %s2151_s13  }
  0x39   : > { %s2280_s26 = scalar_lea.vmem %s2680_s0, %s1531_s20  ;;  %v2038_v21 = vld [vmem:[#allocation2 + $0x80] sm:$0xff]   ;;  %v2042_v25 = vld [vmem:[#allocation2 + $0x88] sm:$0xff]   ;;  %v2039_v28 = vld [vmem:[#allocation2 + $0x70] sm:$0xff]   ;;  %s1529_s30 = sshll.u32 %s177_s29, 3 }
  0x3a   : > { %v2283_v2 = vld [vmem:[%s2280_s26] sm:$0xff]  ;;  %v2288_v3 = vld [vmem:[%s2280_s26 + $0x18] sm:$0xff]  ;;  %v2291_v4 = vld [vmem:[%s2280_s26 + $0x8] sm:$0xff]  ;;  %1802 = vmatpush3.bf16.msra.mxu1 %v2038_v21  ;;  %s1734_s4 = sshll.u32 %s2212_s16, 7  ;;  %s179_s5 = scalar_lea.vmem [#allocation5], %s1529_s30 }
  0x3b   : > { %518 = vperm.xlu0 %1988, %v2283_v2   ;;  %206 = vperm.xlu1 %1987, %v2283_v2   ;;  %v2294_v5 = vld [vmem:[%s2280_s26 + $0x30] sm:$0xff]  ;;  %v2309_v18 = vld [vmem:[%s2280_s26 + $0x20] sm:$0xff]  ;;  %v2315_v23 = vld [vmem:[%s2280_s26 + $0x38] sm:$0xff]  ;;  %s1452_s6 = sshll.u32 %s179_s5, 4  ;;  %s2636_s9 = scalar_lea.hbm %s2683_s3, %s1734_s4  ;;  %s2638_s6 = int_to_ptr.vmem [resolvable:$true] %s1452_s6 }
  0x3c   : > { %1740 = vmatpush3.bf16.msra.mxu0 %v2028_v9  ;;  %v2306_v15 = vld [vmem:[%s2280_s26 + $0x10] sm:$0xff]  ;;  %1803 = vmatprep.subr.bf16.mxu1 %v2040_v22  ;;  %v2037_v26 = vld [vmem:[#allocation2 + $0x28] sm:$0xff]   ;;  %v2047_v31 = vld [vmem:[#allocation2 + $0xd8] sm:$0xff]   ;;  %s1439_s16 = scalar_lea.sflag [#allocation4], %s177_s29  ;;  %s2093_s10 = scalar_lea.vmem %s2638_s6, 128 }
  0x3d   : > { %1741 = vmatprep.subr.bf16.mxu0 %v2029_v10  ;;  %v2321_v29 = vld [vmem:[%s2280_s26 + $0x50] sm:$0xff]  ;;  %v2326_v33 = vld [vmem:[%s2280_s26 + $0x68] sm:$0xff]  ;;  %v2043_v34 = vld [vmem:[#allocation2 + $0x78] sm:$0xff]   ;;  %p2094_p6 = scmp.ne.s32.totalorder %s2638_s6, %s2093_s10  ;;  %p2694_p9 = scmp.ne.s32.totalorder %s2687_s22, 0 }
  0x3e   : > { %1804 = vmatpush3.bf16.msra.mxu1 %v2042_v25  ;;  %v2046_v30 = vld [vmem:[#allocation2 + $0x90] sm:$0xff]   ;;  %v2045_v35 = vld [vmem:[#allocation2 + $0x38] sm:$0xff]   ;;  %v2049_v37 = vld [vmem:[#allocation2 + $0xe0] sm:$0xff]   ;;  %s2170_s11 = smov [#allocation5]  }
  0x3f   : > { %527 = vperm.xlu0 %1988, %v2288_v3   ;;  %209 = vperm.xlu1 %1987, %v2291_v4   ;;  %v2041_v32 = vld [vmem:[#allocation2 + $0x30] sm:$0xff]   ;;  %v2048_v36 = vld [vmem:[#allocation2 + $0x98] sm:$0xff]   ;;  %v2050_v38 = vld [vmem:[#allocation2 + $0xa0] sm:$0xff]   ;;  %p2095_p10 = pnand %p2094_p6, %p2694_p9  ;;  %s2097_s17 = sshll.u32 %s2170_s11, 4  ;;  %s2098_s17 = int_to_ptr.vmem [resolvable:$false] %s2097_s17 }
  0x40   : > { %1742 = vmatpush3.bf16.msra.mxu0 %v2030_v11  ;;  %1805 = vmatprep.subr.bf16.mxu1 %v2044_v27  ;;  %v2051_v39 = vld [vmem:[#allocation2 + $0xe8] sm:$0xff]   ;;  %v2053_v41 = vld [vmem:[#allocation2 + $0xf0] sm:$0xff]   ;;  %v2055_v44 = vld [vmem:[#allocation2 + $0xf8] sm:$0xff]   ;;  %s2099_s19 = scalar_lea.vmem %s2098_s17, 256  ;;  %p2100_p2 = scmp.lt.s32.totalorder %s2638_s6, %s2098_s17 }
  0x41   : > { %1743 = vmatprep.subr.bf16.mxu0 %v2031_v13  ;;  %v2052_v40 = vld [vmem:[#allocation2 + $0xa8] sm:$0xff]   ;;  %v2054_v42 = vld [vmem:[#allocation2 + $0xb0] sm:$0xff]   ;;  %v2056_v45 = vld [vmem:[#allocation2 + $0xb8] sm:$0xff]   ;;  %p2096_p12 = pneg %p2095_p10  ;;  %p2101_p3 = scmp.lt.s32.totalorder %s2099_s19, %s2093_s10 }
  0x42   : > { %1806 = vmatpush3.bf16.msra.mxu1 %v2046_v30  ;;  %v192_v43 = vld [vmem:[%s2280_s26 + $0x28] sm:$0xff]  ;;  %v2350_v46 = vld [vmem:[%s2280_s26 + $0x40] sm:$0xff]  ;;  %v198_v47 = vld [vmem:[%s2280_s26 + $0x58] sm:$0xff] }
  0x43   : > { %536 = vperm.xlu0 %1988, %v2294_v5   ;;  %1989 = vset.pattern.permute.xlu1 %v2164_v0  ;;  %v2358_v48 = vld [vmem:[%s2280_s26 + $0x70] sm:$0xff]  ;;  %v196_v49 = vld [vmem:[%s2280_s26 + $0x48] sm:$0xff]  ;;  %v2367_v50 = vld [vmem:[%s2280_s26 + $0x60] sm:$0xff]  ;;  %p2102_p4 = por %p2101_p3, %p2100_p2 }
  0x44   : > { %521 = vperm.xlu1 %1989, %v2291_v4   ;;  %1744 = vmatpush3.bf16.msra.mxu0 %v2032_v16  ;;  %v2373_v51 = vld [vmem:[%s2280_s26 + $0x78] sm:$0xff]  ;;  %v2057_v9 = vld [vmem:[#allocation2 + $0x100] sm:$0xff]   ;;  %v2058_v13 = vld [vmem:[#allocation2 + $0x108] sm:$0xff]  }
  0x45   : > { %1745 = vmatprep.subr.bf16.mxu0 %v2033_v19  ;;  %1807 = vmatprep.subr.bf16.mxu1 %v2047_v31  ;;  %v2059_v21 = vld [vmem:[#allocation2 + $0x110] sm:$0xff]   ;;  %v2061_v30 = vld [vmem:[#allocation2 + $0x120] sm:$0xff]   ;;  %p2103_p7 = pnand %p2102_p4, %p2096_p12 }
  0x46   : > { %1808 = vmatpush3.bf16.msra.mxu1 %v2048_v36  ;;  %v2064_v36 = vld [vmem:[#allocation2 + $0x138] sm:$0xff]  }
  0x47   : > { %2001 = vset.pattern.permute.xlu0 %v2166_v12  ;;  %1809 = vmatprep.subr.bf16.mxu1 %v2049_v37 }
  0x48   : > { %310 = vperm.xlu0 %2001, %v2283_v2   ;;  %1990 = vset.pattern.permute.xlu1 %v2167_v14 }
  0x49   : > { %414 = vperm.xlu1 %1990, %v2283_v2   ;;  %1746 = vmatpush3.bf16.msra.mxu0 %v2034_v20 }
  0x4a   : > { %1747 = vmatprep.subr.bf16.mxu0 %v2035_v24  ;;  %1810 = vmatpush3.bf16.msra.mxu1 %v2050_v38 }
  0x4b   : > { %1811 = vmatprep.subr.bf16.mxu1 %v2051_v39 }
  0x4c   : > { %313 = vperm.xlu0 %2001, %v2291_v4  }
  0x4d   : > { %1991 = vset.pattern.permute.xlu1 %v2166_v12  ;;  %1748 = vmatpush3.bf16.msra.mxu0 %v2037_v26 }
  0x4e   : > { %316 = vperm.xlu1 %1991, %v2306_v15   ;;  %1749 = vmatprep.subr.bf16.mxu0 %v2039_v28 }
  0x4f   : > { %1812 = vmatpush3.bf16.msra.mxu1 %v2052_v40 }
  0x50   : > { %322 = vperm.xlu0 %2001, %v2309_v18   ;;  %1813 = vmatprep.subr.bf16.mxu1 %v2053_v41 }
  0x51   : > { %1750 = vmatpush3.bf16.msra.mxu0 %v2041_v32 }
  0x52   : > { %319 = vperm.xlu1 %1991, %v2288_v3   ;;  %1751 = vmatprep.subr.bf16.mxu0 %v2043_v34 }
  0x53   : > { %1814 = vmatpush3.bf16.msra.mxu1 %v2054_v42 }
  0x54   : > { %331 = vperm.xlu0 %2001, %v2315_v23   ;;  %1815 = vmatprep.subr.bf16.mxu1 %v2055_v44 }
  0x55   : > { %1752 = vmatpush3.bf16.msra.mxu0 %v2045_v35 }
  0x56   : > { %1992 = vset.pattern.permute.xlu1 %v2165_v1  ;;  %1881 = vmatprep.subr.bf16.mxu0 %v2057_v9 }
  0x57   : > { %215 = vperm.xlu1 %1992, %v2288_v3   ;;  %1816 = vmatpush3.bf16.msra.mxu1 %v2056_v45 }
  0x58   : > { %340 = vperm.xlu0 %2001, %v2321_v29   ;;  %1913 = vmatprep.subr.bf16.mxu1 %v2057_v9 }
  0x5b   : > { %1993 = vset.pattern.permute.xlu1 %v2164_v0 }
  0x5c   : > { %349 = vperm.xlu0 %2001, %v2326_v33   ;;  %524 = vperm.xlu1 %1993, %v2306_v15  }
  0x60   : > { %2013 = vset.pattern.permute.xlu0 %v2167_v14  ;;  %1994 = vset.pattern.permute.xlu1 %v2167_v14 }
  0x61   : > { %417 = vperm.xlu0 %2013, %v2291_v4   ;;  %420 = vperm.xlu1 %1994, %v2306_v15  }
  0x65   : > { %426 = vperm.xlu0 %2013, %v2309_v18   ;;  %423 = vperm.xlu1 %1994, %v2288_v3  }
  0x69   : > { %435 = vperm.xlu0 %2013, %v2315_v23   ;;  %1995 = vset.pattern.permute.xlu1 %v2166_v12 }
  0x6a   : > { %325 = vperm.xlu1 %1995, %v192_v43  }
  0x6d   : > { %444 = vperm.xlu0 %2013, %v2321_v29  }
  0x6e   : > { %1996 = vset.pattern.permute.xlu1 %v2165_v1 }
  0x6f   : > { %218 = vperm.xlu1 %1996, %v2309_v18  }
  0x71   : > { %453 = vperm.xlu0 %2013, %v2326_v33  }
  0x73   : > { %1997 = vset.pattern.permute.xlu1 %v2164_v0 }
  0x74   : > { %530 = vperm.xlu1 %1997, %v2309_v18  }
  0x75   : > { %2017 = vset.pattern.permute.xlu0 %v2165_v1 }
  0x76   : > { %212 = vperm.xlu0 %2017, %v2306_v15  }
  0x78   : > { %533 = vperm.xlu1 %1997, %v192_v43  }
  0x7a   : > { %221 = vperm.xlu0 %2017, %v192_v43  }
  0x7c   : > { %1998 = vset.pattern.permute.xlu1 %v2167_v14 }
  0x7d   : > { %429 = vperm.xlu1 %1998, %v192_v43  }
  0x7e   : > { %230 = vperm.xlu0 %2017, %v2350_v46  }
  0x81   : > { %1999 = vset.pattern.permute.xlu1 %v2166_v12 }
  0x82   : > { %328 = vperm.xlu1 %1999, %v2294_v5   ;;  %239 = vperm.xlu0 %2017, %v198_v47  }
  0x86   : > { %2000 = vset.pattern.permute.xlu1 %v2165_v1  ;;  %248 = vperm.xlu0 %2017, %v2358_v48  }
  0x87   : > { %224 = vperm.xlu1 %2000, %v2294_v5  }
  0x8a   : > { %2019 = vset.pattern.permute.xlu0 %v2164_v0 }
  0x8b   : > { %227 = vperm.xlu1 %2000, %v2315_v23   ;;  %545 = vperm.xlu0 %2019, %v196_v49  }
  0x8f   : > { %2002 = vset.pattern.permute.xlu1 %v2164_v0  ;;  %554 = vperm.xlu0 %2019, %v2367_v50  }
  0x90   : > { %539 = vperm.xlu1 %2002, %v2315_v23  }
  0x93   : > { %563 = vperm.xlu0 %2019, %v2373_v51  }
  0x94   : > { %2003 = vset.pattern.permute.xlu1 %v2167_v14 }
  0x95   : > { %432 = vperm.xlu1 %2003, %v2294_v5  }
  0x97   : > { %2023 = vset.pattern.permute.xlu0 %v2168_v52 }
  0x98   : > { %622 = vperm.xlu0 %2023, %v2283_v2  }
  0x99   : > { %2004 = vset.pattern.permute.xlu1 %v2166_v12 }
  0x9a   : > { %334 = vperm.xlu1 %2004, %v2350_v46  }
  0x9c   : > { %631 = vperm.xlu0 %2023, %v2288_v3  }
  0x9e   : > { %337 = vperm.xlu1 %2004, %v196_v49  }
  0xa0   : > { %649 = vperm.xlu0 %2023, %v196_v49  }
  0xa2   : > { %2005 = vset.pattern.permute.xlu1 %v2165_v1 }
  0xa3   : > { %233 = vperm.xlu1 %2005, %v196_v49  }
  0xa4   : > { %655 = vperm.xlu0 %2023, %v198_v47  }
  0xa7   : > { %2006 = vset.pattern.permute.xlu1 %v2164_v0 }
  0xa8   : > { %542 = vperm.xlu1 %2006, %v2350_v46   ;;  %637 = vperm.xlu0 %2023, %v192_v43  }
  0xac   : > { %2007 = vset.pattern.permute.xlu1 %v2167_v14  ;;  %643 = vperm.xlu0 %2023, %v2315_v23  }
  0xad   : > { %438 = vperm.xlu1 %2007, %v2350_v46  }
  0xb0   : > { %661 = vperm.xlu0 %2023, %v2326_v33  }
  0xb1   : > { %441 = vperm.xlu1 %2007, %v196_v49  }
  0xb4   : > { %667 = vperm.xlu0 %2023, %v2373_v51  }
  0xb5   : > { %2008 = vset.pattern.permute.xlu1 %v2166_v12 }
  0xb6   : > { %343 = vperm.xlu1 %2008, %v198_v47  }
  0xba   : > { %2009 = vset.pattern.permute.xlu1 %v2165_v1  ;;  %v207_v53 = vpop.permute.xlu1 %206  ;;  %v519_v54 = vpop.permute.xlu0 %518 }
  0xbb   : > { %236 = vperm.xlu1 %2009, %v2321_v29   ;;  %vm565_vm0 = vcmp.eq.s32.totalorder %v519_v54, %v2395_v58  ;;  %vm253_vm6 = vcmp.eq.s32.totalorder %v207_v53, %v2395_v58 }
  0xbe   : > { %v210_v56 = vpop.permute.xlu1 %209  ;;  %v528_v57 = vpop.permute.xlu0 %527 }
  0xbf   : > { %2010 = vset.pattern.permute.xlu1 %v2164_v0  ;;  %vm254_vm4 = vcmp.eq.s32.totalorder %v210_v56, %v2395_v58  ;;  %vm568_vm12 = vcmp.eq.s32.totalorder %v528_v57, %v2395_v58 }
  0xc0   : > { %548 = vperm.xlu1 %2010, %v2321_v29   ;;  %vm1654_vm8 = vmpackc.low %vm254_vm4, %vm253_vm6 }
  0xc2   : > { %v2399_v59 = vpop.permute.xlu0 %536 }
  0xc3   : > { %v522_v60 = vpop.permute.xlu1 %521 }
  0xc4   : > { %vm566_vm1 = vcmp.eq.s32.totalorder %v522_v60, %v2395_v58  ;;  %551 = vperm.xlu1 %2010, %v198_v47  }
  0xc5   : > { %vm1684_vm2 = vmpackc.low %vm566_vm1, %vm565_vm0 }
  0xc6   : > { %1685 = vmatprep.mubr.msk.bf16.mxu1 %vm1684_vm2, %v2169_v61 }
  0xc7   : > { %v311_v62 = vpop.permute.xlu0 %310 }
  0xc8   : > { %2011 = vset.pattern.permute.xlu1 %v2167_v14  ;;  %v415_v63 = vpop.permute.xlu1 %414  ;;  %vm357_vm3 = vcmp.eq.s32.totalorder %v311_v62, %v2395_v58 }
  0xc9   : > { %447 = vperm.xlu1 %2011, %v198_v47   ;;  %vm461_vm14 = vcmp.eq.s32.totalorder %v415_v63, %v2395_v58 }
  0xcb   : > { %v314_v2 = vpop.permute.xlu0 %313 }
  0xcc   : > { %vm358_vm5 = vcmp.eq.s32.totalorder %v314_v2, %v2395_v58 }
  0xcd   : > { %2012 = vset.pattern.permute.xlu1 %v2166_v12  ;;  %v317_v3 = vpop.permute.xlu1 %316  ;;  %vm1652_vm7 = vmpackc.low %vm358_vm5, %vm357_vm3 }
  0xce   : > { %1653 = vmatprep.mubr.msk.bf16.mxu0 %vm1652_vm7, %v2169_v61  ;;  %346 = vperm.xlu1 %2012, %v2367_v50   ;;  %vm359_vm9 = vcmp.eq.s32.totalorder %v317_v3, %v2395_v58 }
  0xcf   : > { %1655 = vmatmul.mubr.msk.bf16.vlgmr.msra.gmra.mrb[0].mxu0 %vm1654_vm8, %v2169_v61  ;;  %v2412_v6 = vpop.permute.xlu0 %322 }
  0xd0   : > { %1882 = vmatpush3.bf16.msra.mxu0 %v2057_v9  ;;  %vm361_vm5 = vcmp.eq.s32.totalorder %v2412_v6, %v2395_v58 }
  0xd1   : > { %v320_v7 = vpop.permute.xlu1 %319  ;;  %1883 = vmatprep.subr.bf16.mxu0 %v2058_v13 }
  0xd2   : > { %vm360_vm10 = vcmp.eq.s32.totalorder %v320_v7, %v2395_v58  ;;  %2014 = vset.pattern.permute.xlu1 %v2165_v1 }
  0xd3   : > { %vm1656_vm11 = vmpackc.low %vm360_vm10, %vm359_vm9  ;;  %242 = vperm.xlu1 %2014, %v2367_v50   ;;  %v2418_v8 = vpop.permute.xlu0 %331 }
  0xd4   : > { %1657 = vmatprep.mubr.msk.bf16.mxu0 %vm1656_vm11, %v2169_v61  ;;  %1884 = vmatpush3.bf16.msra.mxu0 %v2058_v13 }
  0xd5   : > { %1885 = vmatprep.subr.bf16.mxu0 %v2059_v21 }
  0xd6   : > { %v2421_v10 = vpop.permute.xlu1 %215 }
  0xd7   : > { %245 = vperm.xlu1 %2014, %v2326_v33   ;;  %v2424_v11 = vpop.permute.xlu0 %340  ;;  %vm256_vm7 = vcmp.eq.s32.totalorder %v2421_v10, %v2395_v58 }
  0xd8   : > { %1886 = vmatpush3.bf16.msra.mxu0 %v2059_v21 }
  0xdb   : > { %2015 = vset.pattern.permute.xlu1 %v2164_v0  ;;  %v525_v16 = vpop.permute.xlu1 %524  ;;  %v2427_v17 = vpop.permute.xlu0 %349 }
  0xdc   : > { %557 = vperm.xlu1 %2015, %v2326_v33   ;;  %vm567_vm13 = vcmp.eq.s32.totalorder %v525_v16, %v2395_v58  ;;  %v2062_v33 = vld [vmem:[#allocation2 + $0x128] sm:$0xff]  }
  0xdd   : > { %vm1688_vm1 = vmpackc.low %vm568_vm12, %vm567_vm13 }
  0xe0   : > { %v418_v19 = vpop.permute.xlu0 %417  ;;  %2016 = vset.pattern.permute.xlu1 %v2167_v14  ;;  %v421_v20 = vpop.permute.xlu1 %420 }
  0xe1   : > { %vm462_vm15 = vcmp.eq.s32.totalorder %v418_v19, %v2395_v58  ;;  %450 = vperm.xlu1 %2016, %v2367_v50   ;;  %vm463_vm3 = vcmp.eq.s32.totalorder %v421_v20, %v2395_v58 }
  0xe2   : > { %vm1686_vm0 = vmpackc.low %vm462_vm15, %vm461_vm14 }
  0xe3   : > { %1687 = vmatmul.mubr.msk.bf16.vlgmr.msra.gmra.mrb[0].mxu1 %vm1686_vm0, %v2169_v61 }
  0xe4   : > { %1689 = vmatprep.mubr.msk.bf16.mxu1 %vm1688_vm1, %v2169_v61  ;;  %v424_v22 = vpop.permute.xlu1 %423  ;;  %v2438_v23 = vpop.permute.xlu0 %426  ;;  %1921 = vmatpush3.bf16.msra.mxu1 %v2057_v9 }
  0xe5   : > { %2018 = vset.pattern.permute.xlu1 %v2166_v12  ;;  %1914 = vmatprep.subr.bf16.mxu1 %v2058_v13  ;;  %vm464_vm2 = vcmp.eq.s32.totalorder %v424_v22, %v2395_v58  ;;  %v2060_v12 = vld [vmem:[#allocation2 + $0x118] sm:$0xff]   ;;  %vm465_vm14 = vcmp.eq.s32.totalorder %v2438_v23, %v2395_v58 }
  0xe6   : > { %352 = vperm.xlu1 %2018, %v2358_v48   ;;  %vm1690_vm4 = vmpackc.low %vm464_vm2, %vm463_vm3  ;;  %1887 = vmatprep.subr.bf16.mxu0 %v2060_v12 }
  0xe7   : > { %1888 = vmatpush3.bf16.msra.mxu0 %v2060_v12 }
  0xe8   : > { %v2443_v24 = vpop.permute.xlu0 %435  ;;  %1922 = vmatpush3.bf16.msra.mxu1 %v2058_v13  ;;  %1889 = vmatprep.subr.bf16.mxu0 %v2061_v30 }
  0xe9   : > { %v326_v25 = vpop.permute.xlu1 %325  ;;  %1915 = vmatprep.subr.bf16.mxu1 %v2059_v21 }
  0xea   : > { %355 = vperm.xlu1 %2018, %v2373_v51   ;;  %vm362_vm6 = vcmp.eq.s32.totalorder %v326_v25, %v2395_v58 }
  0xeb   : > { %1691 = vmatmul.mubr.msk.bf16.gmra.mrb[4].mxu1 %vm1690_vm4, %v2169_v61  ;;  %1890 = vmatpush3.bf16.msra.mxu0 %v2061_v30  ;;  %vm1660_vm10 = vmpackc.low %vm362_vm6, %vm361_vm5  ;;  %vm364_vm4 = vcmp.eq.s32.totalorder %v2418_v8, %v2395_v58 }
  0xec   : > { %v2448_v26 = vpop.permute.xlu0 %444  ;;  %1923 = vmatpush3.bf16.msra.mxu1 %v2059_v21  ;;  %1891 = vmatprep.subr.bf16.mxu0 %v2062_v33 }
  0xed   : > { %1916 = vmatprep.subr.bf16.mxu1 %v2060_v12 }
  0xee   : > { %2020 = vset.pattern.permute.xlu1 %v2165_v1  ;;  %v219_v27 = vpop.permute.xlu1 %218 }
  0xef   : > { %251 = vperm.xlu1 %2020, %v2373_v51   ;;  %1892 = vmatpush3.bf16.msra.mxu0 %v2062_v33  ;;  %vm257_vm1 = vcmp.eq.s32.totalorder %v219_v27, %v2395_v58 }
  0xf0   : > { %v2452_v28 = vpop.permute.xlu0 %453  ;;  %1924 = vmatpush3.bf16.msra.mxu1 %v2060_v12 }
  0xf1   : > { %1917 = vmatprep.subr.bf16.mxu1 %v2061_v30 }
  0xf3   : > { %2021 = vset.pattern.permute.xlu1 %v2164_v0  ;;  %v531_v31 = vpop.permute.xlu1 %530 }
  0xf4   : > { %560 = vperm.xlu1 %2021, %v2358_v48   ;;  %1925 = vmatpush3.bf16.msra.mxu1 %v2061_v30  ;;  %vm569_vm11 = vcmp.eq.s32.totalorder %v531_v31, %v2395_v58 }
  0xf5   : > { %v213_v1 = vpop.permute.xlu0 %212  ;;  %1918 = vmatprep.subr.bf16.mxu1 %v2062_v33 }
  0xf6   : > { %vm255_vm8 = vcmp.eq.s32.totalorder %v213_v1, %v2395_v58 }
  0xf7   : > { %vm1658_vm9 = vmpackc.low %vm256_vm7, %vm255_vm8  ;;  %v534_v0 = vpop.permute.xlu1 %533 }
  0xf8   : > { %vm570_vm12 = vcmp.eq.s32.totalorder %v534_v0, %v2395_v58  ;;  %2022 = vset.pattern.permute.xlu1 %v2167_v14  ;;  %1659 = vmatmul.mubr.msk.bf16.gmra.mrb[4].mxu0 %vm1658_vm9, %v2169_v61  ;;  %v2063_v14 = vld [vmem:[#allocation2 + $0x130] sm:$0xff]  }
  0xf9   : > { %vm1692_vm13 = vmpackc.low %vm570_vm12, %vm569_vm11  ;;  %v222_v32 = vpop.permute.xlu0 %221  ;;  %456 = vperm.xlu1 %2022, %v2358_v48   ;;  %1661 = vmatprep.mubr.msk.bf16.mxu0 %vm1660_vm10, %v2169_v61  ;;  %vm571_vm10 = vcmp.eq.s32.totalorder %v2399_v59, %v2395_v58 }
  0xfa   : > { %1693 = vmatprep.mubr.msk.bf16.mxu1 %vm1692_vm13, %v2169_v61  ;;  %vm258_vm15 = vcmp.eq.s32.totalorder %v222_v32, %v2395_v58  ;;  %1926 = vmatpush3.bf16.msra.mxu1 %v2062_v33  ;;  %vm468_vm13 = vcmp.eq.s32.totalorder %v2443_v24, %v2395_v58 }
  0xfb   : > { %vm1662_vm3 = vmpackc.low %vm258_vm15, %vm257_vm1  ;;  %1893 = vmatprep.subr.bf16.mxu0 %v2063_v14  ;;  %1919 = vmatprep.subr.bf16.mxu1 %v2063_v14 }
  0xfc   : > { %v430_v34 = vpop.permute.xlu1 %429  ;;  %1894 = vmatpush3.bf16.msra.mxu0 %v2063_v14 }
  0xfd   : > { %vm466_vm0 = vcmp.eq.s32.totalorder %v430_v34, %v2395_v58  ;;  %459 = vperm.xlu1 %2022, %v2373_v51   ;;  %1895 = vmatprep.subr.bf16.mxu0 %v2064_v36 }
  0xfe   : > { %vm1694_vm2 = vmpackc.low %vm466_vm0, %vm465_vm14  ;;  %1927 = vmatpush3.bf16.msra.mxu1 %v2063_v14 }
  0xff   : > { %1695 = vmatmul.mubr.msk.bf16.gmra.mrb[8].mxu1 %vm1694_vm2, %v2169_v61  ;;  %1920 = vmatprep.subr.bf16.mxu1 %v2064_v36 }
 0x100   : > { %1663 = vmatmul.mubr.msk.bf16.gmra.mrb[8].mxu0 %vm1662_vm3, %v2169_v61 }
 0x101   : > { %2024 = vset.pattern.permute.xlu1 %v2168_v52  ;;  %v329_v35 = vpop.permute.xlu1 %328  ;;  %1896 = vmatpush3.bf16.msra.mxu0 %v2064_v36 }
 0x102   : > { %vm363_vm5 = vcmp.eq.s32.totalorder %v329_v35, %v2395_v58  ;;  %625 = vperm.xlu1 %2024, %v2291_v4   ;;  %1928 = vmatpush3.bf16.msra.mxu1 %v2064_v36 }
 0x103   : > { %vm1664_vm6 = vmpackc.low %vm364_vm4, %vm363_vm5 }
 0x104   : > { %1665 = vmatprep.mubr.msk.bf16.mxu0 %vm1664_vm6, %v2169_v61 }
 0x106   : > { %628 = vperm.xlu1 %2024, %v2306_v15   ;;  %v225_v37 = vpop.permute.xlu1 %224  ;;  %v231_v15 = vpop.permute.xlu0 %230 }
 0x107   : > { %vm259_vm7 = vcmp.eq.s32.totalorder %v225_v37, %v2395_v58  ;;  %vm261_vm3 = vcmp.eq.s32.totalorder %v231_v15, %v2395_v58 }
 0x10a   : > { %646 = vperm.xlu1 %2024, %v2350_v46   ;;  %v228_v38 = vpop.permute.xlu1 %227 }
 0x10b   : > { %vm260_vm8 = vcmp.eq.s32.totalorder %v228_v38, %v2395_v58 }
 0x10c   : > { %vm1666_vm9 = vmpackc.low %vm260_vm8, %vm259_vm7 }
 0x10d   : > { %1667 = vmatmul.mubr.msk.bf16.gmra.mrb[12].mxu0 %vm1666_vm9, %v2169_v61 }
 0x10e   : > { %652 = vperm.xlu1 %2024, %v2321_v29   ;;  %v240_v29 = vpop.permute.xlu0 %239 }
 0x10f   : > { %v540_v4 = vpop.permute.xlu1 %539 }
 0x110   : > { %vm572_vm11 = vcmp.eq.s32.totalorder %v540_v4, %v2395_v58 }
 0x111   : > { %vm1696_vm12 = vmpackc.low %vm572_vm11, %vm571_vm10 }
 0x112   : > { %634 = vperm.xlu1 %2024, %v2309_v18   ;;  %1697 = vmatprep.mubr.msk.bf16.mxu1 %vm1696_vm12, %v2169_v61  ;;  %v2500_v42 = vpop.permute.xlu0 %248  ;;  %vm367_vm12 = vcmp.eq.s32.totalorder %v2424_v11, %v2395_v58 }
 0x114   : > { %v433_v39 = vpop.permute.xlu1 %432 }
 0x115   : > { %vm467_vm14 = vcmp.eq.s32.totalorder %v433_v39, %v2395_v58 }
 0x116   : > { %vm1698_vm15 = vmpackc.low %vm468_vm13, %vm467_vm14  ;;  %640 = vperm.xlu1 %2024, %v2294_v5   ;;  %v546_v18 = vpop.permute.xlu0 %545 }
 0x117   : > { %1699 = vmatmul.mubr.msk.bf16.gmra.mrb[12].mxu1 %vm1698_vm15, %v2169_v61  ;;  %vm574_vm6 = vcmp.eq.s32.totalorder %v546_v18, %v2395_v58  ;;  %vm264_vm15 = vcmp.eq.s32.totalorder %v240_v29, %v2395_v58 }
 0x119   : > { %v335_v40 = vpop.permute.xlu1 %334 }
 0x11a   : > { %658 = vperm.xlu1 %2024, %v2367_v50   ;;  %vm365_vm0 = vcmp.eq.s32.totalorder %v335_v40, %v2395_v58  ;;  %v555_v54 = vpop.permute.xlu0 %554 }
 0x11d   : > { %v338_v41 = vpop.permute.xlu1 %337 }
 0x11e   : > { %vm366_vm1 = vcmp.eq.s32.totalorder %v338_v41, %v2395_v58  ;;  %664 = vperm.xlu1 %2024, %v2358_v48   ;;  %v564_v60 = vpop.permute.xlu0 %563 }
 0x11f   : > { %vm1668_vm2 = vmpackc.low %vm366_vm1, %vm365_vm0 }
 0x120   : > { %1669 = vmatprep.mubr.msk.bf16.mxu0 %vm1668_vm2, %v2169_v61 }
 0x122   : > { %v234_v5 = vpop.permute.xlu1 %233  ;;  %v623_v63 = vpop.permute.xlu0 %622 }
 0x123   : > { %vm262_vm4 = vcmp.eq.s32.totalorder %v234_v5, %v2395_v58 }
 0x124   : > { %vm1670_vm5 = vmpackc.low %vm262_vm4, %vm261_vm3 }
 0x125   : > { %1671 = vmatmul.mubr.msk.bf16.gmra.mrb[16].mxu0 %vm1670_vm5, %v2169_v61  ;;  %vm471_vm5 = vcmp.eq.s32.totalorder %v2448_v26, %v2395_v58 }
 0x126   : > { %v632_v3 = vpop.permute.xlu0 %631 }
 0x127   : > { %v543_v43 = vpop.permute.xlu1 %542 }
 0x128   : > { %vm573_vm7 = vcmp.eq.s32.totalorder %v543_v43, %v2395_v58 }
 0x129   : > { %vm1700_vm8 = vmpackc.low %vm574_vm6, %vm573_vm7 }
 0x12a   : > { %1701 = vmatprep.mubr.msk.bf16.mxu1 %vm1700_vm8, %v2169_v61  ;;  %vm370_vm8 = vcmp.eq.s32.totalorder %v2427_v17, %v2395_v58  ;;  %v650_v8 = vpop.permute.xlu0 %649 }
 0x12c   : > { %v439_v44 = vpop.permute.xlu1 %438 }
 0x12d   : > { %vm469_vm9 = vcmp.eq.s32.totalorder %v439_v44, %v2395_v58 }
 0x12e   : > { %v656_v10 = vpop.permute.xlu0 %655 }
 0x130   : > { %v442_v45 = vpop.permute.xlu1 %441 }
 0x131   : > { %vm470_vm10 = vcmp.eq.s32.totalorder %v442_v45, %v2395_v58 }
 0x132   : > { %vm1702_vm11 = vmpackc.low %vm470_vm10, %vm469_vm9  ;;  %v638_v13 = vpop.permute.xlu0 %637 }
 0x133   : > { %1703 = vmatmul.mubr.msk.bf16.gmra.mrb[16].mxu1 %vm1702_vm11, %v2169_v61 }
 0x135   : > { %v344_v46 = vpop.permute.xlu1 %343 }
 0x136   : > { %vm368_vm13 = vcmp.eq.s32.totalorder %v344_v46, %v2395_v58  ;;  %v644_v19 = vpop.permute.xlu0 %643 }
 0x137   : > { %vm1672_vm14 = vmpackc.low %vm368_vm13, %vm367_vm12 }
 0x138   : > { %1673 = vmatprep.mubr.msk.bf16.mxu0 %vm1672_vm14, %v2169_v61  ;;  %vm577_vm14 = vcmp.eq.s32.totalorder %v555_v54, %v2395_v58 }
 0x13a   : > { %v237_v47 = vpop.permute.xlu1 %236  ;;  %v662_v21 = vpop.permute.xlu0 %661 }
 0x13b   : > { %vm263_vm0 = vcmp.eq.s32.totalorder %v237_v47, %v2395_v58 }
 0x13c   : > { %vm1674_vm1 = vmpackc.low %vm264_vm15, %vm263_vm0 }
 0x13d   : > { %1675 = vmatmul.mubr.msk.bf16.gmra.mrb[20].mxu0 %vm1674_vm1, %v2169_v61  ;;  %vm474_vm1 = vcmp.eq.s32.totalorder %v2452_v28, %v2395_v58 }
 0x13e   : > { %v668_v24 = vpop.permute.xlu0 %667 }
 0x13f   : > { %v549_v48 = vpop.permute.xlu1 %548 }
 0x140   : > { %vm575_vm2 = vcmp.eq.s32.totalorder %v549_v48, %v2395_v58 }
 0x143   : > { %v552_v49 = vpop.permute.xlu1 %551 }
 0x144   : > { %vm576_vm3 = vcmp.eq.s32.totalorder %v552_v49, %v2395_v58 }
 0x145   : > { %vm1704_vm4 = vmpackc.low %vm576_vm3, %vm575_vm2 }
 0x146   : > { %1705 = vmatprep.mubr.msk.bf16.mxu1 %vm1704_vm4, %v2169_v61 }
 0x148   : > { %v448_v50 = vpop.permute.xlu1 %447 }
 0x149   : > { %vm472_vm6 = vcmp.eq.s32.totalorder %v448_v50, %v2395_v58 }
 0x14a   : > { %vm1706_vm7 = vmpackc.low %vm472_vm6, %vm471_vm5 }
 0x14b   : > { %1707 = vmatmul.mubr.msk.bf16.gmra.mrb[20].mxu1 %vm1706_vm7, %v2169_v61  ;;  %vm267_vm7 = vcmp.eq.s32.totalorder %v2500_v42, %v2395_v58 }
 0x14d   : > { %v347_v51 = vpop.permute.xlu1 %346 }
 0x14e   : > { %vm369_vm9 = vcmp.eq.s32.totalorder %v347_v51, %v2395_v58 }
 0x14f   : > { %vm1676_vm10 = vmpackc.low %vm370_vm8, %vm369_vm9 }
 0x150   : > { %1677 = vmatprep.mubr.msk.bf16.mxu0 %vm1676_vm10, %v2169_v61  ;;  %vm580_vm10 = vcmp.eq.s32.totalorder %v564_v60, %v2395_v58 }
 0x152   : > { %v243_v52 = vpop.permute.xlu1 %242 }
 0x153   : > { %vm265_vm11 = vcmp.eq.s32.totalorder %v243_v52, %v2395_v58 }
 0x156   : > { %v246_v53 = vpop.permute.xlu1 %245 }
 0x157   : > { %vm266_vm12 = vcmp.eq.s32.totalorder %v246_v53, %v2395_v58 }
 0x158   : > { %vm1678_vm13 = vmpackc.low %vm266_vm12, %vm265_vm11 }
 0x159   : > { %1679 = vmatmul.mubr.msk.bf16.gmra.mrb[24].mxu0 %vm1678_vm13, %v2169_v61 }
 0x15b   : > { %v558_v55 = vpop.permute.xlu1 %557 }
 0x15c   : > { %vm578_vm15 = vcmp.eq.s32.totalorder %v558_v55, %v2395_v58 }
 0x15d   : > { %vm1708_vm0 = vmpackc.low %vm578_vm15, %vm577_vm14 }
 0x15e   : > { %1709 = vmatprep.mubr.msk.bf16.mxu1 %vm1708_vm0, %v2169_v61  ;;  %vm669_vm0 = vcmp.eq.s32.totalorder %v623_v63, %v2395_v58 }
 0x160   : > { %v451_v56 = vpop.permute.xlu1 %450 }
 0x161   : > { %vm473_vm2 = vcmp.eq.s32.totalorder %v451_v56, %v2395_v58 }
 0x162   : > { %vm1710_vm3 = vmpackc.low %vm474_vm1, %vm473_vm2 }
 0x163   : > { %1711 = vmatmul.mubr.msk.bf16.gmra.mrb[24].mxu1 %vm1710_vm3, %v2169_v61  ;;  %vm672_vm3 = vcmp.eq.s32.totalorder %v632_v3, %v2395_v58 }
 0x165   : > { %v353_v57 = vpop.permute.xlu1 %352 }
 0x166   : > { %vm371_vm4 = vcmp.eq.s32.totalorder %v353_v57, %v2395_v58 }
 0x169   : > { %v356_v59 = vpop.permute.xlu1 %355 }
 0x16a   : > { %vm372_vm5 = vcmp.eq.s32.totalorder %v356_v59, %v2395_v58 }
 0x16b   : > { %vm1680_vm6 = vmpackc.low %vm372_vm5, %vm371_vm4 }
 0x16c   : > { %1681 = vmatprep.mubr.msk.bf16.mxu0 %vm1680_vm6, %v2169_v61  ;;  %vm678_vm6 = vcmp.eq.s32.totalorder %v650_v8, %v2395_v58 }
 0x16e   : > { %v252_v62 = vpop.permute.xlu1 %251 }
 0x16f   : > { %vm268_vm8 = vcmp.eq.s32.totalorder %v252_v62, %v2395_v58 }
 0x170   : > { %vm1682_vm9 = vmpackc.low %vm268_vm8, %vm267_vm7 }
 0x171   : > { %1683 = vmatmul.mubr.msk.bf16.gmra.mrb[28].mxu0 %vm1682_vm9, %v2169_v61  ;;  %vm680_vm9 = vcmp.eq.s32.totalorder %v656_v10, %v2395_v58 }
 0x173   : > { %v561_v2 = vpop.permute.xlu1 %560 }
 0x174   : > { %vm579_vm11 = vcmp.eq.s32.totalorder %v561_v2, %v2395_v58 }
 0x175   : > { %vm1712_vm12 = vmpackc.low %vm580_vm10, %vm579_vm11 }
 0x176   : > { %1713 = vmatprep.mubr.msk.bf16.mxu1 %vm1712_vm12, %v2169_v61  ;;  %vm674_vm12 = vcmp.eq.s32.totalorder %v638_v13, %v2395_v58 }
 0x178   : > { %v457_v6 = vpop.permute.xlu1 %456 }
 0x179   : > { %vm475_vm13 = vcmp.eq.s32.totalorder %v457_v6, %v2395_v58 }
 0x17c   : > { %v460_v7 = vpop.permute.xlu1 %459 }
 0x17d   : > { %vm476_vm14 = vcmp.eq.s32.totalorder %v460_v7, %v2395_v58 }
 0x17e   : > { %vm1714_vm15 = vmpackc.low %vm476_vm14, %vm475_vm13 }
 0x17f   : > { %1715 = vmatmul.mubr.msk.bf16.gmra.mrb[28].mxu1 %vm1714_vm15, %v2169_v61  ;;  %vm676_vm15 = vcmp.eq.s32.totalorder %v644_v19, %v2395_v58 }
 0x181   : > { %v626_v9 = vpop.permute.xlu1 %625 }
 0x182   : > { %vm670_vm1 = vcmp.eq.s32.totalorder %v626_v9, %v2395_v58 }
 0x183   : > { %vm1716_vm2 = vmpackc.low %vm670_vm1, %vm669_vm0 }
 0x184   : > { %1897 = vmatprep.mubr.msk.bf16.mxu0 %vm1716_vm2, %v2169_v61  ;;  %vm682_vm2 = vcmp.eq.s32.totalorder %v662_v21, %v2395_v58 }
 0x185   : > { %v629_v11 = vpop.permute.xlu1 %628 }
 0x186   : > { %vm671_vm4 = vcmp.eq.s32.totalorder %v629_v11, %v2395_v58 }
 0x187   : > { %vm1718_vm5 = vmpackc.low %vm672_vm3, %vm671_vm4 }
 0x188   : > { %1898 = vmatmul.mubr.msk.bf16.vlgmr.msra.gmra.mrb[32].mxu0 %vm1718_vm5, %v2169_v61  ;;  %vm684_vm5 = vcmp.eq.s32.totalorder %v668_v24, %v2395_v58 }
 0x189   : > { %v647_v16 = vpop.permute.xlu1 %646 }
 0x18a   : > { %vm677_vm7 = vcmp.eq.s32.totalorder %v647_v16, %v2395_v58 }
 0x18b   : > { %vm1724_vm8 = vmpackc.low %vm678_vm6, %vm677_vm7 }
 0x18c   : > { %1905 = vmatprep.mubr.msk.bf16.mxu1 %vm1724_vm8, %v2169_v61  ;;  %vm1416_vm8 = vcmask 1041409  }
 0x18d   : > { %v653_v17 = vpop.permute.xlu1 %652 }
 0x18e   : > { %vm679_vm10 = vcmp.eq.s32.totalorder %v653_v17, %v2395_v58 }
 0x18f   : > { %vm1726_vm11 = vmpackc.low %vm680_vm9, %vm679_vm10  ;;  %vm1419_vm9 = vcmask 1042434   ;;  %vm1422_vm10 = vcmask 1043459  }
 0x190   : > { %1906 = vmatmul.mubr.msk.bf16.vlgmr.msra.gmra.mrb[32].mxu1 %vm1726_vm11, %v2169_v61  ;;  %vm1425_vm11 = vcmask 1044484  }
 0x191   : > { %v635_v20 = vpop.permute.xlu1 %634 }
 0x192   : > { %vm673_vm13 = vcmp.eq.s32.totalorder %v635_v20, %v2395_v58 }
 0x193   : > { %vm1720_vm14 = vmpackc.low %vm674_vm12, %vm673_vm13  ;;  %vm1428_vm12 = vcmask 1045509   ;;  %vm1431_vm13 = vcmask 1046534  }
 0x194   : > { %1901 = vmatprep.mubr.msk.bf16.mxu0 %vm1720_vm14, %v2169_v61  ;;  %vm1434_vm14 = vcmask 1047559  }
 0x195   : > { %v641_v22 = vpop.permute.xlu1 %640 }
 0x196   : > { %vm675_vm0 = vcmp.eq.s32.totalorder %v641_v22, %v2395_v58 }
 0x197   : > { %vm1722_vm1 = vmpackc.low %vm676_vm15, %vm675_vm0 }
 0x198   : > { %1902 = vmatmul.mubr.msk.bf16.gmra.mrb[36].mxu0 %vm1722_vm1, %v2169_v61 }
 0x199   : > { %v659_v23 = vpop.permute.xlu1 %658 }
 0x19a   : > { %vm681_vm3 = vcmp.eq.s32.totalorder %v659_v23, %v2395_v58 }
 0x19b   : > { %vm1728_vm4 = vmpackc.low %vm682_vm2, %vm681_vm3 }
 0x19c   : > { %1909 = vmatprep.mubr.msk.bf16.mxu1 %vm1728_vm4, %v2169_v61 }
 0x19d   : > { %v665_v25 = vpop.permute.xlu1 %664 }
 0x19e   : > { %vm683_vm6 = vcmp.eq.s32.totalorder %v665_v25, %v2395_v58 }
 0x19f   : > { %vm1730_vm7 = vmpackc.low %vm684_vm5, %vm683_vm6 }
 0x1a0   : > { %1910 = vmatmul.mubr.msk.bf16.gmra.mrb[36].mxu1 %vm1730_vm7, %v2169_v61 }
 0x1a2   : > { %v1753_v12 = vpop.f32.mrb[0].mxu0 }
 0x1a3   : > { %v1754_v26 = vpop.f32.mrb[1].mxu0 }
 0x1a4   : > { %v1755_v27 = vadd.f32 %v1754_v26, %v1753_v12  ;;  %v1756_v28 = vpop.f32.mrb[2].mxu0 }
 0x1a5   : > { %v1757_v30 = vpop.f32.mrb[3].mxu0 }
 0x1a6   : > { %v1758_v31 = vadd.f32 %v1757_v30, %v1756_v28 }
 0x1b6   : > { %v1817_v1 = vpop.f32.mrb[0].mxu1 }
 0x1b7   : > { %v1818_v0 = vpop.f32.mrb[1].mxu1 }
 0x1b8   : > { %v1819_v32 = vadd.f32 %v1818_v0, %v1817_v1  ;;  %v1820_v33 = vpop.f32.mrb[2].mxu1 }
 0x1b9   : > { %v1821_v34 = vpop.f32.mrb[3].mxu1 }
 0x1ba   : > { %v1822_v14 = vadd.f32 %v1821_v34, %v1820_v33  ;;  %v2580_v35 = vadd.f32 %v1819_v32, %v1755_v27 }
 0x1bc   : > { %v2582_v36 = vadd.f32 %v1822_v14, %v1758_v31 }
 0x1be   : > { %v1823_v58 = vpop.f32.mrb[4].mxu1 }
 0x1bf   : > { %v1824_v37 = vpop.f32.mrb[5].mxu1 }
 0x1c0   : > { %v1825_v38 = vadd.f32 %v1824_v37, %v1823_v58  ;;  %v1826_v61 = vpop.f32.mrb[6].mxu1 }
 0x1c1   : > { %v1827_v4 = vpop.f32.mrb[7].mxu1 }
 0x1c2   : > { %v1828_v15 = vadd.f32 %v1827_v4, %v1826_v61 }
 0x1cb   : > { %v1759_v39 = vpop.f32.mrb[4].mxu0 }
 0x1cc   : > { %v1760_v29 = vpop.f32.mrb[5].mxu0 }
 0x1cd   : > { %v1761_v40 = vadd.f32 %v1760_v29, %v1759_v39  ;;  %v1762_v41 = vpop.f32.mrb[6].mxu0 }
 0x1ce   : > { %v1763_v42 = vpop.f32.mrb[7].mxu0 }
 0x1cf   : > { %v1764_v5 = vadd.f32 %v1763_v42, %v1762_v41  ;;  %v2584_v18 = vadd.f32 %v1825_v38, %v1761_v40 }
 0x1d1   : > { %v2586_v43 = vadd.f32 %v1828_v15, %v1764_v5 }
 0x1d2   : > { %v1829_v44 = vpop.f32.mrb[8].mxu1 }
 0x1d3   : > { %v1765_v45 = vpop.f32.mrb[8].mxu0  ;;  %v1830_v46 = vpop.f32.mrb[9].mxu1 }
 0x1d4   : > { %v1831_v47 = vadd.f32 %v1830_v46, %v1829_v44  ;;  %v1766_v48 = vpop.f32.mrb[9].mxu0  ;;  %v1832_v49 = vpop.f32.mrb[10].mxu1 }
 0x1d5   : > { %v1767_v50 = vadd.f32 %v1766_v48, %v1765_v45  ;;  %v1768_v51 = vpop.f32.mrb[10].mxu0  ;;  %v1833_v52 = vpop.f32.mrb[11].mxu1 }
 0x1d6   : > { %v1834_v53 = vadd.f32 %v1833_v52, %v1832_v49  ;;  %v1769_v54 = vpop.f32.mrb[11].mxu0 }
 0x1d7   : > { %v1770_v55 = vadd.f32 %v1769_v54, %v1768_v51  ;;  %v2588_v56 = vadd.f32 %v1831_v47, %v1767_v50 }
 0x1d9   : > { %v2590_v57 = vadd.f32 %v1834_v53, %v1770_v55 }
 0x1e0   : > { %v1771_v59 = vpop.f32.mrb[12].mxu0 }
 0x1e1   : > { %v1772_v60 = vpop.f32.mrb[13].mxu0 }
 0x1e2   : > { %v1773_v62 = vadd.f32 %v1772_v60, %v1771_v59  ;;  %v1774_v63 = vpop.f32.mrb[14].mxu0 }
 0x1e3   : > { %v1775_v2 = vpop.f32.mrb[15].mxu0 }
 0x1e4   : > { %v1776_v3 = vadd.f32 %v1775_v2, %v1774_v63 }
 0x1ea   : > { %v1835_v6 = vpop.f32.mrb[12].mxu1 }
 0x1eb   : > { %v1836_v7 = vpop.f32.mrb[13].mxu1 }
 0x1ec   : > { %v1837_v8 = vadd.f32 %v1836_v7, %v1835_v6  ;;  %v1838_v9 = vpop.f32.mrb[14].mxu1 }
 0x1ed   : > { %v1839_v10 = vpop.f32.mrb[15].mxu1 }
 0x1ee   : > { %v1840_v11 = vadd.f32 %v1839_v10, %v1838_v9  ;;  %v2592_v13 = vadd.f32 %v1837_v8, %v1773_v62 }
 0x1f0   : > { %v2594_v16 = vadd.f32 %v1840_v11, %v1776_v3 }
 0x1f8   : > { %v1777_v17 = vpop.f32.mrb[16].mxu0 }
 0x1f9   : > { %v1778_v19 = vpop.f32.mrb[17].mxu0 }
 0x1fa   : > { %v1779_v20 = vadd.f32 %v1778_v19, %v1777_v17  ;;  %v1780_v21 = vpop.f32.mrb[18].mxu0 }
 0x1fb   : > { %v1781_v22 = vpop.f32.mrb[19].mxu0 }
 0x1fc   : > { %v1782_v23 = vadd.f32 %v1781_v22, %v1780_v21 }
 0x206   : > { %v1841_v24 = vpop.f32.mrb[16].mxu1 }
 0x207   : > { %v1842_v25 = vpop.f32.mrb[17].mxu1 }
 0x208   : > { %v1843_v12 = vadd.f32 %v1842_v25, %v1841_v24  ;;  %v1844_v26 = vpop.f32.mrb[18].mxu1 }
 0x209   : > { %v1845_v27 = vpop.f32.mrb[19].mxu1 }
 0x20a   : > { %v1846_v28 = vadd.f32 %v1845_v27, %v1844_v26  ;;  %v1209_v30 = vadd.f32 %v1843_v12, %v1779_v20 }
 0x20c   : > { %v2596_v31 = vadd.f32 %v1846_v28, %v1782_v23 }
 0x210   : > { %v1783_v1 = vpop.f32.mrb[20].mxu0 }
 0x211   : > { %v1784_v0 = vpop.f32.mrb[21].mxu0 }
 0x212   : > { %v1785_v32 = vadd.f32 %v1784_v0, %v1783_v1  ;;  %v1786_v33 = vpop.f32.mrb[22].mxu0 }
 0x213   : > { %v1787_v34 = vpop.f32.mrb[23].mxu0 }
 0x214   : > { %v1788_v14 = vadd.f32 %v1787_v34, %v1786_v33 }
 0x21e   : > { %v1847_v58 = vpop.f32.mrb[20].mxu1 }
 0x21f   : > { %v1848_v37 = vpop.f32.mrb[21].mxu1 }
 0x220   : > { %v1849_v38 = vadd.f32 %v1848_v37, %v1847_v58  ;;  %v1850_v61 = vpop.f32.mrb[22].mxu1 }
 0x221   : > { %v1851_v4 = vpop.f32.mrb[23].mxu1 }
 0x222   : > { %v1852_v15 = vadd.f32 %v1851_v4, %v1850_v61  ;;  %v1217_v39 = vadd.f32 %v1849_v38, %v1785_v32 }
 0x224   : > { %v1220_v29 = vadd.f32 %v1852_v15, %v1788_v14 }
 0x22c   : > { %v1789_v40 = vpop.f32.mrb[24].mxu0 }
 0x22d   : > { %v1790_v41 = vpop.f32.mrb[25].mxu0 }
 0x22e   : > { %v1791_v42 = vadd.f32 %v1790_v41, %v1789_v40  ;;  %v1792_v5 = vpop.f32.mrb[26].mxu0 }
 0x22f   : > { %v1793_v44 = vpop.f32.mrb[27].mxu0 }
 0x230   : > { %v1794_v45 = vadd.f32 %v1793_v44, %v1792_v5 }
 0x236   : > { %v1853_v46 = vpop.f32.mrb[24].mxu1 }
 0x237   : > { %v1854_v47 = vpop.f32.mrb[25].mxu1 }
 0x238   : > { %v1855_v48 = vadd.f32 %v1854_v47, %v1853_v46  ;;  %v1856_v49 = vpop.f32.mrb[26].mxu1 }
 0x239   : > { %v1857_v50 = vpop.f32.mrb[27].mxu1 }
 0x23a   : > { %v1858_v51 = vadd.f32 %v1857_v50, %v1856_v49  ;;  %v2598_v52 = vadd.f32 %v1855_v48, %v1791_v42 }
 0x23c   : > { %v2600_v53 = vadd.f32 %v1858_v51, %v1794_v45 }
 0x244   : > { %v1795_v54 = vpop.f32.mrb[28].mxu0 }
 0x245   : > { %v1796_v55 = vpop.f32.mrb[29].mxu0 }
 0x246   : > { %v1797_v59 = vadd.f32 %v1796_v55, %v1795_v54  ;;  %v1798_v60 = vpop.f32.mrb[30].mxu0 }
 0x247   : > { %v1799_v62 = vpop.f32.mrb[31].mxu0 }
 0x248   : > { %v1800_v63 = vadd.f32 %v1799_v62, %v1798_v60 }
 0x252   : > { %v1859_v2 = vpop.f32.mrb[28].mxu1 }
 0x253   : > { %v1860_v3 = vpop.f32.mrb[29].mxu1 }
 0x254   : > { %v1861_v6 = vadd.f32 %v1860_v3, %v1859_v2  ;;  %v1862_v7 = vpop.f32.mrb[30].mxu1 }
 0x255   : > { %v1863_v8 = vpop.f32.mrb[31].mxu1 }
 0x256   : > { %v1864_v9 = vadd.f32 %v1863_v8, %v1862_v7  ;;  %v1233_v10 = vadd.f32 %v1861_v6, %v1797_v59 }
 0x258   : > { %v2602_v11 = vadd.f32 %v1864_v9, %v1800_v63 }
 0x25b   : > { %v1899_v17 = vpop.f32.mrb[32].mxu0 }
 0x25c   : > { %v1282_v19 = vadd.f32 %v1899_v17, %v2584_v18  ;;  %v1273_v20 = vpop.f32.mrb[33].mxu0 }
 0x25d   : > { %v1274_v21 = vadd.f32 %v1273_v20, %v2580_v35  ;;  %v1900_v22 = vpop.f32.mrb[34].mxu0 }
 0x25e   : > { %v1285_v23 = vadd.f32 %v1900_v22, %v2586_v43  ;;  %v1276_v24 = vpop.f32.mrb[35].mxu0 }
 0x25f   : > { %v1277_v25 = vadd.f32 %v1276_v24, %v2582_v36 }
 0x260   : > { %v1343_v12 = vmax.f32 %v1282_v19, %v1285_v23 }
 0x261   : > { %v1336_v26 = vmax.f32 %v1274_v21, %v1277_v25 }
 0x262   : > { %v1344_v27 = vrot.slane %v1343_v12, 4 }
 0x263   : > { %v1337_v28 = vrot.slane %v1336_v26, 4  ;;  %v1907_v1 = vpop.f32.mrb[32].mxu1 }
 0x264   : > { %v1345_v0 = vmax.f32 %v1343_v12, %v1344_v27  ;;  %v1314_v32 = vadd.f32 %v1907_v1, %v1217_v39  ;;  %v1305_v33 = vpop.f32.mrb[33].mxu1  ;;  %v2612_v39 = vld [vmem:[%s2682_s2] ss:$0 sm:$0xff] }
 0x265   : > { %v1338_v34 = vmax.f32 %v1336_v26, %v1337_v28  ;;  %v1306_v14 = vadd.f32 %v1305_v33, %v1209_v30  ;;  %v1908_v18 = vpop.f32.mrb[34].mxu1 }
 0x266   : > { %v1346_v58 = vrot.slane %v1345_v0, 2  ;;  %v1317_v37 = vadd.f32 %v1908_v18, %v1220_v29  ;;  %v1308_v35 = vpop.f32.mrb[35].mxu1 }
 0x267   : > { %v1339_v38 = vrot.slane %v1338_v34, 2  ;;  %v1309_v43 = vadd.f32 %v1308_v35, %v2596_v31 }
 0x268   : > { %v1347_v61 = vmax.f32 %v1345_v0, %v1346_v58  ;;  %v1371_v4 = vmax.f32 %v1314_v32, %v1317_v37 }
 0x269   : > { %v1340_v36 = vmax.f32 %v1338_v34, %v1339_v38  ;;  %v1364_v15 = vmax.f32 %v1306_v14, %v1309_v43 }
 0x26a   : > { %v1348_v40 = vrot.slane %v1347_v61, 1  ;;  %v1372_v41 = vrot.slane %v1371_v4, 4 }
 0x26b   : > { %v1341_v42 = vrot.slane %v1340_v36, 1  ;;  %v1365_v30 = vrot.slane %v1364_v15, 4  ;;  %v1903_v5 = vpop.f32.mrb[36].mxu0 }
 0x26c   : > { %v1349_v44 = vmax.f32 %v1347_v61, %v1348_v40  ;;  %v1373_v29 = vmax.f32 %v1371_v4, %v1372_v41  ;;  %v1298_v45 = vadd.f32 %v1903_v5, %v2592_v13  ;;  %v1289_v46 = vpop.f32.mrb[37].mxu0 }
 0x26d   : > { %v1342_v31 = vmax.f32 %v1340_v36, %v1341_v42  ;;  %v1366_v47 = vmax.f32 %v1364_v15, %v1365_v30  ;;  %v1290_v48 = vadd.f32 %v1289_v46, %v2588_v56  ;;  %v1904_v49 = vpop.f32.mrb[38].mxu0 }
 0x26e   : > { %v1400_v50 = vadd.f32 %v2612_v39, %v1349_v44  ;;  %v1301_v51 = vadd.f32 %v1904_v49, %v2594_v16  ;;  %v1292_v54 = vpop.f32.mrb[39].mxu0  ;;  %v1374_v63 = vrot.slane %v1373_v29, 2 }
 0x26f   : > { %v1399_v55 = vadd.f32 %v2612_v39, %v1342_v31  ;;  %v1367_v59 = vrot.slane %v1366_v47, 2  ;;  %v1293_v60 = vadd.f32 %v1292_v54, %v2590_v57 }
 0x270   : > { %v1415_v62 = vrot.slane %v1400_v50, 7  ;;  %v1357_v13 = vmax.f32 %v1298_v45, %v1301_v51  ;;  %v1375_v9 = vmax.f32 %v1373_v29, %v1374_v63 }
 0x271   : > { %v1350_v2 = vmax.f32 %v1290_v48, %v1293_v60  ;;  %v1368_v7 = vmax.f32 %v1366_v47, %v1367_v59 }
 0x272   : > { %v1417_v3 = vsel %vm1416_vm8, %v1415_v62, %v1399_v55  ;;  %v1358_v6 = vrot.slane %v1357_v13, 4  ;;  %v1376_v27 = vrot.slane %v1375_v9, 1 }
 0x273   : > { %v1351_v56 = vrot.slane %v1350_v2, 4  ;;  %v1911_v8 = vpop.f32.mrb[36].mxu1  ;;  %v1369_v25 = vrot.slane %v1368_v7, 1 }
 0x274   : > { %v1359_v17 = vmax.f32 %v1357_v13, %v1358_v6  ;;  %v1330_v19 = vadd.f32 %v1911_v8, %v1233_v10  ;;  %v1321_v16 = vpop.f32.mrb[37].mxu1  ;;  %v1377_v18 = vmax.f32 %v1375_v9, %v1376_v27 }
 0x275   : > { %v1352_v20 = vmax.f32 %v1350_v2, %v1351_v56  ;;  %v1322_v21 = vadd.f32 %v1321_v16, %v2598_v52  ;;  %v1912_v22 = vpop.f32.mrb[38].mxu1  ;;  %v1370_v34 = vmax.f32 %v1368_v7, %v1369_v25 }
 0x276   : > { %v1360_v23 = vrot.slane %v1359_v17, 2  ;;  %v1333_v57 = vadd.f32 %v1912_v22, %v2602_v11  ;;  %v1324_v24 = vpop.f32.mrb[39].mxu1  ;;  %v1404_v36 = vadd.f32 %v2612_v39, %v1377_v18 }
 0x277   : > { %v1353_v12 = vrot.slane %v1352_v20, 2  ;;  %v1325_v26 = vadd.f32 %v1324_v24, %v2600_v53  ;;  %v1403_v43 = vadd.f32 %v2612_v39, %v1370_v34 }
 0x278   : > { %v1361_v28 = vmax.f32 %v1359_v17, %v1360_v23  ;;  %v1385_v1 = vmax.f32 %v1330_v19, %v1333_v57  ;;  %v1427_v45 = vrot.slane %v1404_v36, 3 }
 0x279   : > { %v1354_v0 = vmax.f32 %v1352_v20, %v1353_v12  ;;  %v1378_v32 = vmax.f32 %v1322_v21, %v1325_v26  ;;  %v1424_v5 = vrot.slane %v1403_v43, 4 }
 0x27a   : > { %v1362_v10 = vrot.slane %v1361_v28, 1  ;;  %v1386_v33 = vrot.slane %v1385_v1, 4 }
 0x27b   : > { %v1355_v14 = vrot.slane %v1354_v0, 1  ;;  %v1379_v52 = vrot.slane %v1378_v32, 4 }
 0x27c   : > { %v1363_v58 = vmax.f32 %v1361_v28, %v1362_v10  ;;  %v1387_v37 = vmax.f32 %v1385_v1, %v1386_v33 }
 0x27d   : > { %v1356_v11 = vmax.f32 %v1354_v0, %v1355_v14  ;;  %v1380_v35 = vmax.f32 %v1378_v32, %v1379_v52 }
 0x27e   : > { %v1402_v38 = vadd.f32 %v2612_v39, %v1363_v58  ;;  %v1388_v53 = vrot.slane %v1387_v37, 2 }
 0x27f   : > { %v1401_v61 = vadd.f32 %v2612_v39, %v1356_v11  ;;  %v1381_v4 = vrot.slane %v1380_v35, 2 }
 0x280   : > { %v1389_v15 = vmax.f32 %v1387_v37, %v1388_v53  ;;  %v1421_v42 = vrot.slane %v1402_v38, 5 }
 0x281   : > { %v1418_v40 = vrot.slane %v1401_v61, 6  ;;  %v1382_v41 = vmax.f32 %v1380_v35, %v1381_v4 }
 0x282   : > { %v1390_v30 = vrot.slane %v1389_v15, 1 }
 0x283   : > { %v1420_v44 = vsel %vm1419_vm9, %v1418_v40, %v1417_v3  ;;  %v1383_v29 = vrot.slane %v1382_v41, 1 }
 0x284   : > { %v1391_v46 = vmax.f32 %v1389_v15, %v1390_v30  ;;  %v1423_v31 = vsel %vm1422_vm10, %v1421_v42, %v1420_v44 }
 0x285   : > { %v1384_v47 = vmax.f32 %v1382_v41, %v1383_v29  ;;  %v1426_v48 = vsel %vm1425_vm11, %v1424_v5, %v1423_v31 }
 0x286   : > { %v1406_v49 = vadd.f32 %v2612_v39, %v1391_v46  ;;  %v1429_v50 = vsel %vm1428_vm12, %v1427_v45, %v1426_v48 }
 0x287   : > { %v1405_v51 = vadd.f32 %v2612_v39, %v1384_v47 }
 0x288   : > { %v1433_v55 = vrot.slane %v1406_v49, 1 }
 0x289   : > { %v1430_v54 = vrot.slane %v1405_v51, 2 }
 0x28b   : > { %v1432_v59 = vsel %vm1431_vm13, %v1430_v54, %v1429_v50 }
 0x28c   : > { %v1435_v39 = vsel %vm1434_vm14, %v1433_v55, %v1432_v59 }
 0x28d   : > { %1437 = vst [vmem:[%s179_s5] sm:$0xff] %v1435_v39 }
 0x28e   : > { %2106 = shalt.err (!%p2103_p7)
}
 0x28f   : > { %s2107_s20 = scalar_lea.hbm %s2636_s9, 128  ;;  %s2111_s26 = scalar_lea.hbm %s2683_s3, 256 }
 0x290   : > { %p2108_p8 = scmp.ne.s32.totalorder %s2636_s9, %s2107_s20  ;;  %p2112_p1 = scmp.lt.u32.totalorder %s2636_s9, %s2683_s3 }
 0x291   : > { %p2113_p0 = scmp.lt.u32.totalorder %s2111_s26, %s2107_s20  ;;  %p2115_p6 = scmp.lt.u32.totalorder %s2107_s20, %s2636_s9 }
 0x292   : > { %p2109_p11 = pnand %p2108_p8, %p2694_p9 }
 0x293   : > { %p2114_p5 = por %p2113_p0, %p2112_p1 }
 0x294   : > { %p2110_p13 = pneg %p2109_p11 }
 0x295   : > { %p2116_p10 = por %p2115_p6, %p2114_p5 }
 0x297   : > { %p2117_p12 = pnand %p2116_p10, %p2110_p13 }
 0x299   : > { %2120 = shalt.err (!%p2117_p12)
}
 0x29a   : > { %1933 = dma.vmem_to_hbm [thread:$0]  (%p2694_p9), %s2638_s6, 128, %s2636_s9, %s1439_s16  }
 0x29b PF: > { %p1945_p2 = scmp.ge.s32.totalorder %s2159_s15, 2  ;;  %s1464_s29 = sand.u32 1, %s2147_s12  }
 0x29c   : > { %p2695_p3 = scmp.ne.s32.totalorder %s2688_s23, 0  ;;  %s1465_s30 = scalar_lea.sflag [#allocation4], %s1464_s29 }
 0x29e   : > { %p1940_p4 = pnand %p1945_p2, %p2695_p3 }
 0x2a0   : > { %2142 = dma.done.wait (!%p1940_p4), %s1465_s30, 128  }
 0x2a1   : > { %2144 = vsyncadd (!%p1940_p4), %s1465_s30, 4294967168  ;;  %p14_p7 = scmp.ge.s32.totalorder %s2216_s18, 4   ;;  %s2696_s12 = smov %s2151_s13 }
 0x2a2   : > { %s2697_s13 = smov %s2155_s14  ;;  %s2698_s14 = smov %s2227_s21 }
 0x2a3   : > { %s2699_s15 = smov %s2216_s18  ;;  %16 = sbr.rel (!%p14_p7) target bundleno = 4 (0x4), region = 72 }
 0x2aa   :  { %1470 = vsyncpa [#allocation3], 1 }
 0x2ab   :  { %1472 = vsyncpa [#allocation3 + $0x1], 1 }
 0x2ac   :  { %1473 = vsyncpa [#allocation4], 1 }
 0x2ad   :  { %1475 = vsyncpa [#allocation4 + $0x1], 1 }

</bundles_post_ra>
